<compile_context>
chip_gen: v7x
topology: tpu7x:2x2x1
jax: 0.10.0
libtpu: 0.0.40
codegen_flags: <defaults>
</compile_context>

<pallas_src>
import functools

import jax
import jax.numpy as jnp
from jax.experimental import pallas as pl
from jax.experimental.pallas import tpu as pltpu


# ----------------------------- Pallas kernel -------------------------------


def _make_fused_net_kernel(num_layers, hidden, out_channels):
    """Fully fused Net forward. Ref layout (5 full-array VMEM inputs):

      a_ref [N, N]          bf16  dense A + I  (A[dst, src], identity folded in)
      p_ref [B, N]          bf16  one-hot global_add_pool matrix
      x_ref [N, H]          bf16  node features, zero-padded Cin -> H columns
      w_ref [(2L+2)*H, H]   bf16  weight slab: per layer (w1f | w2), head (w1 | w2)
                                  w1f has eval-BN folded in; first w1f rows and
                                  head-w2 columns are zero-padded to H
      b_ref [2L+2, H]       f32   bias slab:  per layer (s1, b2), head (b1, b2)
      o_ref [B, O]          f32
    """

    def kernel(a_ref, p_ref, x_ref, w_ref, b_ref, o_ref):
        a = a_ref[...]                       # [N, N] bf16, stays live across layers
        x = x_ref[...]                       # [N, H] bf16

        def wblk(i):                          # static slice of the weight slab
            return w_ref[i * hidden:(i + 1) * hidden, :]

        def brow(i):                          # static slice of the bias slab
            return b_ref[i:i + 1, :]

        for layer in range(num_layers):       # unrolled at trace time
            w1f, w2 = wblk(2 * layer), wblk(2 * layer + 1)
            s1, b2 = brow(2 * layer), brow(2 * layer + 1)

            # GIN aggregation (eps=0): x_i + sum_{j in N(i)} x_j == (A+I) @ x  (MXU)
            h = jnp.dot(a, x, preferred_element_type=jnp.float32)
            # MLP: Linear(+folded eval-BN) -> ReLU -> Linear, then the outer .relu()
            z = jnp.dot(h.astype(jnp.bfloat16), w1f,
                        preferred_element_type=jnp.float32) + s1
            z = jnp.maximum(z, 0.0)
            z = jnp.dot(z.astype(jnp.bfloat16), w2,
                        preferred_element_type=jnp.float32) + b2
            # bias-add / ReLU stay f32; only MXU operands are bf16 (v5e-safe)
            x = jnp.maximum(z, 0.0).astype(jnp.bfloat16)

        hw1, hw2 = wblk(2 * num_layers), wblk(2 * num_layers + 1)
        hb1, hb2 = brow(2 * num_layers), brow(2 * num_layers + 1)

        # global_add_pool as P @ x, then head MLP (norm=None; dropout=identity in eval)
        pooled = jnp.dot(p_ref[...], x, preferred_element_type=jnp.float32)
        h = jnp.dot(pooled.astype(jnp.bfloat16), hw1,
                    preferred_element_type=jnp.float32) + hb1
        h = jnp.maximum(h, 0.0)
        out = jnp.dot(h.astype(jnp.bfloat16), hw2,
                      preferred_element_type=jnp.float32) + hb2
        o_ref[...] = out[:, :out_channels]    # drop the zero-padded head columns

    return kernel


_VMEM = pl.BlockSpec(memory_space=pltpu.MemorySpace.VMEM)


def _fused_forward(adj_plus_i, pool, x_pad, w_slab, b_slab,
                   num_layers, hidden, out_channels):
    b, n = pool.shape
    flops = int(2 * (num_layers * (n * n * hidden + 2 * n * hidden * hidden)
                     + b * n * hidden + 2 * b * hidden * hidden))
    bytes_accessed = int(adj_plus_i.size * 2 + pool.size * 2 + x_pad.size * 2
                         + w_slab.size * 2 + b_slab.size * 4
                         + b * out_channels * 4)
    return pl.pallas_call(
        _make_fused_net_kernel(num_layers, hidden, out_channels),
        out_shape=jax.ShapeDtypeStruct((b, out_channels), jnp.float32),
        in_specs=[_VMEM] * 5,
        out_specs=_VMEM,
        cost_estimate=pl.CostEstimate(flops=flops, transcendentals=0,
                                      bytes_accessed=bytes_accessed),
    )(adj_plus_i, pool, x_pad, w_slab, b_slab)


# ------------------------------ Model wrapper -------------------------------


def init_params(key, in_channels, hidden_channels, out_channels, num_layers):
    """Deterministic synthetic parameters matching the module's shapes."""
    params = {"convs": []}
    c_in = in_channels
    bn_eps = 1e-5
    for _ in range(num_layers):
        key, k1, k2, k3, k4 = jax.random.split(key, 5)
        w1 = jax.random.normal(k1, (c_in, hidden_channels), jnp.float32) * 0.1
        b1 = jax.random.normal(k2, (1, hidden_channels), jnp.float32) * 0.01
        w2 = jax.random.normal(k3, (hidden_channels, hidden_channels), jnp.float32) * 0.1
        b2 = jax.random.normal(k4, (1, hidden_channels), jnp.float32) * 0.01
        # eval-mode BatchNorm as affine: gamma=1, beta=0, running mean=0, var=1
        scale = jnp.full((1, hidden_channels), 1.0 / jnp.sqrt(1.0 + bn_eps), jnp.float32)
        shift = jnp.zeros((1, hidden_channels), jnp.float32)
        params["convs"].append(
            dict(w1=w1, b1=b1, scale=scale, shift=shift, w2=w2, b2=b2))
        c_in = hidden_channels

    key, k1, k2, k3, k4 = jax.random.split(key, 5)
    params["head"] = dict(
        w1=jax.random.normal(k1, (hidden_channels, hidden_channels), jnp.float32) * 0.1,
        b1=jax.random.normal(k2, (1, hidden_channels), jnp.float32) * 0.01,
        w2=jax.random.normal(k3, (hidden_channels, out_channels), jnp.float32) * 0.1,
        b2=jax.random.normal(k4, (1, out_channels), jnp.float32) * 0.01,
    )
    return params


def pack_params(params, in_channels, hidden, out_channels, num_layers):
    """Done ONCE outside jit: fold eval-mode BN into the first Linear of every GIN
    MLP (BN(h@W1+b1) == h@(W1*scale) + (b1*scale+shift)) and pack everything into
    one bf16 weight slab and one f32 bias slab (lane-aligned, uniform H-row blocks).
    """
    w_blocks, b_rows = [], []
    c_in = in_channels
    for lp in params["convs"]:
        w1f = lp["w1"] * lp["scale"]
        s1 = lp["b1"] * lp["scale"] + lp["shift"]
        w1f_pad = jnp.zeros((hidden, hidden), jnp.float32).at[:c_in, :].set(w1f)
        w_blocks += [w1f_pad, lp["w2"]]
        b_rows += [s1, lp["b2"]]
        c_in = hidden

    hp = params["head"]
    hw2_pad = jnp.zeros((hidden, hidden), jnp.float32).at[:, :out_channels].set(hp["w2"])
    hb2_pad = jnp.zeros((1, hidden), jnp.float32).at[:, :out_channels].set(hp["b2"])
    w_blocks += [hp["w1"], hw2_pad]
    b_rows += [hp["b1"], hb2_pad]

    w_slab = jnp.concatenate(w_blocks, axis=0).astype(jnp.bfloat16)   # [(2L+2)*H, H]
    b_slab = jnp.concatenate(b_rows, axis=0).astype(jnp.float32)      # [2L+2, H]
    return dict(w_slab=w_slab, b_slab=b_slab)


@functools.partial(jax.jit,
                   static_argnames=("num_graphs", "num_layers", "hidden",
                                    "out_channels"))
def net_forward(packed, x, edge_index, batch, num_graphs, num_layers, hidden,
                out_channels):
    """Forward pass. x:[N,Cin] f32, edge_index:[2,E] int32, batch:[N] int32."""
    n, c_in = x.shape

    # Glue (plain JAX, cheap at toy size): densify graph structure once per forward.
    src, dst = edge_index[0], edge_index[1]
    # A + I so (A+I)@x gives the GIN self term + neighbor sum in one matmul (eps=0).
    # Counts (0/1/2/...) and one-hot entries are exactly representable in bf16.
    adj_plus_i = jnp.eye(n, dtype=jnp.float32).at[dst, src].add(1.0).astype(jnp.bfloat16)
    pool = (batch[None, :] == jnp.arange(num_graphs)[:, None]).astype(jnp.bfloat16)
    x_pad = jnp.zeros((n, hidden), jnp.float32).at[:, :c_in].set(x).astype(jnp.bfloat16)

    return _fused_forward(adj_plus_i, pool, x_pad,
                          packed["w_slab"], packed["b_slab"],
                          num_layers, hidden, out_channels)


# ---------------------------------- Main ------------------------------------

if __name__ == "__main__":
    IN_CHANNELS = 8
    HIDDEN_CHANNELS = 32
    OUT_CHANNELS = 4
    NUM_LAYERS = 3
    N_NODES = 16
    N_EDGES = 40
    N_GRAPHS = 2

    key = jax.random.PRNGKey(0)
    key, kx, ke = jax.random.split(key, 3)

    x = jax.random.normal(kx, (N_NODES, IN_CHANNELS), jnp.float32)
    edge_index = jax.random.randint(ke, (2, N_EDGES), 0, N_NODES, jnp.int32)
    # nodes 0..7 -> graph 0, nodes 8..15 -> graph 1
    batch = (jnp.arange(N_NODES, dtype=jnp.int32) >= (N_NODES // 2)).astype(jnp.int32)

    params = init_params(key, IN_CHANNELS, HIDDEN_CHANNELS, OUT_CHANNELS, NUM_LAYERS)
    packed = pack_params(params, IN_CHANNELS, HIDDEN_CHANNELS, OUT_CHANNELS, NUM_LAYERS)

    out = net_forward(packed, x, edge_index, batch, N_GRAPHS, NUM_LAYERS,
                      HIDDEN_CHANNELS, OUT_CHANNELS)
    out = jax.block_until_ready(out)
    assert out.shape == (N_GRAPHS, OUT_CHANNELS)
    assert jnp.all(jnp.isfinite(out))
    print("KERNEL_OK")
</pallas_src>

<mosaic_0001>
module attributes {stable_mosaic.version = 11 : i64} {
  func.func @kernel(%arg0: memref<16x16xbf16, #tpu.memory_space<vmem>>, %arg1: memref<2x16xbf16, #tpu.memory_space<vmem>>, %arg2: memref<16x32xbf16, #tpu.memory_space<vmem>>, %arg3: memref<256x32xbf16, #tpu.memory_space<vmem>>, %arg4: memref<8x32xf32, #tpu.memory_space<vmem>>, %arg5: memref<2x4xf32, #tpu.memory_space<vmem>>) attributes {dimension_semantics = [], scalar_prefetch = 0 : i64, scratch_operands = 0 : i64, tpu.core_type = #tpu.core_type<tc>} {
    %c0 = arith.constant 0 : index
    %c0_0 = arith.constant 0 : index
    %0 = vector.load %arg0[%c0, %c0_0] : memref<16x16xbf16, #tpu.memory_space<vmem>>, vector<16x16xbf16>
    %c0_1 = arith.constant 0 : index
    %c0_2 = arith.constant 0 : index
    %1 = vector.load %arg2[%c0_1, %c0_2] : memref<16x32xbf16, #tpu.memory_space<vmem>>, vector<16x32xbf16>
    %c0_3 = arith.constant 0 : index
    %c0_4 = arith.constant 0 : index
    %2 = vector.load %arg3[%c0_3, %c0_4] : memref<256x32xbf16, #tpu.memory_space<vmem>>, vector<32x32xbf16>
    %c32 = arith.constant 32 : index
    %c0_5 = arith.constant 0 : index
    %3 = vector.load %arg3[%c32, %c0_5] : memref<256x32xbf16, #tpu.memory_space<vmem>>, vector<32x32xbf16>
    %c0_6 = arith.constant 0 : index
    %c0_7 = arith.constant 0 : index
    %4 = vector.load %arg4[%c0_6, %c0_7] : memref<8x32xf32, #tpu.memory_space<vmem>>, vector<1x32xf32>
    %c1 = arith.constant 1 : index
    %c0_8 = arith.constant 0 : index
    %5 = vector.load %arg4[%c1, %c0_8] : memref<8x32xf32, #tpu.memory_space<vmem>>, vector<1x32xf32>
    %cst = arith.constant dense<0.000000e+00> : vector<16x32xf32>
    %6 = tpu.matmul %0, %1, %cst {dimension_numbers = #tpu.dot_dimension_numbers<[1], [0], [0], [1], [0, 0, 1, 1], [], []>} : vector<16x16xbf16>, vector<16x32xbf16>, vector<16x32xf32> -> vector<16x32xf32>
    %7 = arith.truncf %6 : vector<16x32xf32> to vector<16x32xbf16>
    %cst_9 = arith.constant dense<0.000000e+00> : vector<16x32xf32>
    %8 = tpu.matmul %7, %2, %cst_9 {dimension_numbers = #tpu.dot_dimension_numbers<[1], [0], [0], [1], [0, 0, 1, 1], [], []>} : vector<16x32xbf16>, vector<32x32xbf16>, vector<16x32xf32> -> vector<16x32xf32>
    %9 = vector.broadcast %4 : vector<1x32xf32> to vector<16x32xf32>
    %10 = arith.addf %8, %9 : vector<16x32xf32>
    %cst_10 = arith.constant 0.000000e+00 : f32
    %11 = vector.broadcast %cst_10 : f32 to vector<16x32xf32>
    %12 = arith.maximumf %10, %11 : vector<16x32xf32>
    %13 = arith.truncf %12 : vector<16x32xf32> to vector<16x32xbf16>
    %cst_11 = arith.constant dense<0.000000e+00> : vector<16x32xf32>
    %14 = tpu.matmul %13, %3, %cst_11 {dimension_numbers = #tpu.dot_dimension_numbers<[1], [0], [0], [1], [0, 0, 1, 1], [], []>} : vector<16x32xbf16>, vector<32x32xbf16>, vector<16x32xf32> -> vector<16x32xf32>
    %15 = vector.broadcast %5 : vector<1x32xf32> to vector<16x32xf32>
    %16 = arith.addf %14, %15 : vector<16x32xf32>
    %cst_12 = arith.constant 0.000000e+00 : f32
    %17 = vector.broadcast %cst_12 : f32 to vector<16x32xf32>
    %18 = arith.maximumf %16, %17 : vector<16x32xf32>
    %19 = arith.truncf %18 : vector<16x32xf32> to vector<16x32xbf16>
    %c64 = arith.constant 64 : index
    %c0_13 = arith.constant 0 : index
    %20 = vector.load %arg3[%c64, %c0_13] : memref<256x32xbf16, #tpu.memory_space<vmem>>, vector<32x32xbf16>
    %c96 = arith.constant 96 : index
    %c0_14 = arith.constant 0 : index
    %21 = vector.load %arg3[%c96, %c0_14] : memref<256x32xbf16, #tpu.memory_space<vmem>>, vector<32x32xbf16>
    %c2 = arith.constant 2 : index
    %c0_15 = arith.constant 0 : index
    %22 = vector.load %arg4[%c2, %c0_15] : memref<8x32xf32, #tpu.memory_space<vmem>>, vector<1x32xf32>
    %c3 = arith.constant 3 : index
    %c0_16 = arith.constant 0 : index
    %23 = vector.load %arg4[%c3, %c0_16] : memref<8x32xf32, #tpu.memory_space<vmem>>, vector<1x32xf32>
    %cst_17 = arith.constant dense<0.000000e+00> : vector<16x32xf32>
    %24 = tpu.matmul %0, %19, %cst_17 {dimension_numbers = #tpu.dot_dimension_numbers<[1], [0], [0], [1], [0, 0, 1, 1], [], []>} : vector<16x16xbf16>, vector<16x32xbf16>, vector<16x32xf32> -> vector<16x32xf32>
    %25 = arith.truncf %24 : vector<16x32xf32> to vector<16x32xbf16>
    %cst_18 = arith.constant dense<0.000000e+00> : vector<16x32xf32>
    %26 = tpu.matmul %25, %20, %cst_18 {dimension_numbers = #tpu.dot_dimension_numbers<[1], [0], [0], [1], [0, 0, 1, 1], [], []>} : vector<16x32xbf16>, vector<32x32xbf16>, vector<16x32xf32> -> vector<16x32xf32>
    %27 = vector.broadcast %22 : vector<1x32xf32> to vector<16x32xf32>
    %28 = arith.addf %26, %27 : vector<16x32xf32>
    %cst_19 = arith.constant 0.000000e+00 : f32
    %29 = vector.broadcast %cst_19 : f32 to vector<16x32xf32>
    %30 = arith.maximumf %28, %29 : vector<16x32xf32>
    %31 = arith.truncf %30 : vector<16x32xf32> to vector<16x32xbf16>
    %cst_20 = arith.constant dense<0.000000e+00> : vector<16x32xf32>
    %32 = tpu.matmul %31, %21, %cst_20 {dimension_numbers = #tpu.dot_dimension_numbers<[1], [0], [0], [1], [0, 0, 1, 1], [], []>} : vector<16x32xbf16>, vector<32x32xbf16>, vector<16x32xf32> -> vector<16x32xf32>
    %33 = vector.broadcast %23 : vector<1x32xf32> to vector<16x32xf32>
    %34 = arith.addf %32, %33 : vector<16x32xf32>
    %cst_21 = arith.constant 0.000000e+00 : f32
    %35 = vector.broadcast %cst_21 : f32 to vector<16x32xf32>
    %36 = arith.maximumf %34, %35 : vector<16x32xf32>
    %37 = arith.truncf %36 : vector<16x32xf32> to vector<16x32xbf16>
    %c128 = arith.constant 128 : index
    %c0_22 = arith.constant 0 : index
    %38 = vector.load %arg3[%c128, %c0_22] : memref<256x32xbf16, #tpu.memory_space<vmem>>, vector<32x32xbf16>
    %c160 = arith.constant 160 : index
    %c0_23 = arith.constant 0 : index
    %39 = vector.load %arg3[%c160, %c0_23] : memref<256x32xbf16, #tpu.memory_space<vmem>>, vector<32x32xbf16>
    %c4 = arith.constant 4 : index
    %c0_24 = arith.constant 0 : index
    %40 = vector.load %arg4[%c4, %c0_24] : memref<8x32xf32, #tpu.memory_space<vmem>>, vector<1x32xf32>
    %c5 = arith.constant 5 : index
    %c0_25 = arith.constant 0 : index
    %41 = vector.load %arg4[%c5, %c0_25] : memref<8x32xf32, #tpu.memory_space<vmem>>, vector<1x32xf32>
    %cst_26 = arith.constant dense<0.000000e+00> : vector<16x32xf32>
    %42 = tpu.matmul %0, %37, %cst_26 {dimension_numbers = #tpu.dot_dimension_numbers<[1], [0], [0], [1], [0, 0, 1, 1], [], []>} : vector<16x16xbf16>, vector<16x32xbf16>, vector<16x32xf32> -> vector<16x32xf32>
    %43 = arith.truncf %42 : vector<16x32xf32> to vector<16x32xbf16>
    %cst_27 = arith.constant dense<0.000000e+00> : vector<16x32xf32>
    %44 = tpu.matmul %43, %38, %cst_27 {dimension_numbers = #tpu.dot_dimension_numbers<[1], [0], [0], [1], [0, 0, 1, 1], [], []>} : vector<16x32xbf16>, vector<32x32xbf16>, vector<16x32xf32> -> vector<16x32xf32>
    %45 = vector.broadcast %40 : vector<1x32xf32> to vector<16x32xf32>
    %46 = arith.addf %44, %45 : vector<16x32xf32>
    %cst_28 = arith.constant 0.000000e+00 : f32
    %47 = vector.broadcast %cst_28 : f32 to vector<16x32xf32>
    %48 = arith.maximumf %46, %47 : vector<16x32xf32>
    %49 = arith.truncf %48 : vector<16x32xf32> to vector<16x32xbf16>
    %cst_29 = arith.constant dense<0.000000e+00> : vector<16x32xf32>
    %50 = tpu.matmul %49, %39, %cst_29 {dimension_numbers = #tpu.dot_dimension_numbers<[1], [0], [0], [1], [0, 0, 1, 1], [], []>} : vector<16x32xbf16>, vector<32x32xbf16>, vector<16x32xf32> -> vector<16x32xf32>
    %51 = vector.broadcast %41 : vector<1x32xf32> to vector<16x32xf32>
    %52 = arith.addf %50, %51 : vector<16x32xf32>
    %cst_30 = arith.constant 0.000000e+00 : f32
    %53 = vector.broadcast %cst_30 : f32 to vector<16x32xf32>
    %54 = arith.maximumf %52, %53 : vector<16x32xf32>
    %55 = arith.truncf %54 : vector<16x32xf32> to vector<16x32xbf16>
    %c192 = arith.constant 192 : index
    %c0_31 = arith.constant 0 : index
    %56 = vector.load %arg3[%c192, %c0_31] : memref<256x32xbf16, #tpu.memory_space<vmem>>, vector<32x32xbf16>
    %c224 = arith.constant 224 : index
    %c0_32 = arith.constant 0 : index
    %57 = vector.load %arg3[%c224, %c0_32] : memref<256x32xbf16, #tpu.memory_space<vmem>>, vector<32x32xbf16>
    %c6 = arith.constant 6 : index
    %c0_33 = arith.constant 0 : index
    %58 = vector.load %arg4[%c6, %c0_33] : memref<8x32xf32, #tpu.memory_space<vmem>>, vector<1x32xf32>
    %c7 = arith.constant 7 : index
    %c0_34 = arith.constant 0 : index
    %59 = vector.load %arg4[%c7, %c0_34] : memref<8x32xf32, #tpu.memory_space<vmem>>, vector<1x32xf32>
    %c0_35 = arith.constant 0 : index
    %c0_36 = arith.constant 0 : index
    %60 = vector.load %arg1[%c0_35, %c0_36] : memref<2x16xbf16, #tpu.memory_space<vmem>>, vector<2x16xbf16>
    %cst_37 = arith.constant dense<0.000000e+00> : vector<2x32xf32>
    %61 = tpu.matmul %60, %55, %cst_37 {dimension_numbers = #tpu.dot_dimension_numbers<[1], [0], [0], [1], [0, 0, 1, 1], [], []>} : vector<2x16xbf16>, vector<16x32xbf16>, vector<2x32xf32> -> vector<2x32xf32>
    %62 = arith.truncf %61 : vector<2x32xf32> to vector<2x32xbf16>
    %cst_38 = arith.constant dense<0.000000e+00> : vector<2x32xf32>
    %63 = tpu.matmul %62, %56, %cst_38 {dimension_numbers = #tpu.dot_dimension_numbers<[1], [0], [0], [1], [0, 0, 1, 1], [], []>} : vector<2x32xbf16>, vector<32x32xbf16>, vector<2x32xf32> -> vector<2x32xf32>
    %64 = vector.broadcast %58 : vector<1x32xf32> to vector<2x32xf32>
    %65 = arith.addf %63, %64 : vector<2x32xf32>
    %cst_39 = arith.constant 0.000000e+00 : f32
    %66 = vector.broadcast %cst_39 : f32 to vector<2x32xf32>
    %67 = arith.maximumf %65, %66 : vector<2x32xf32>
    %68 = arith.truncf %67 : vector<2x32xf32> to vector<2x32xbf16>
    %cst_40 = arith.constant dense<0.000000e+00> : vector<2x32xf32>
    %69 = tpu.matmul %68, %57, %cst_40 {dimension_numbers = #tpu.dot_dimension_numbers<[1], [0], [0], [1], [0, 0, 1, 1], [], []>} : vector<2x32xbf16>, vector<32x32xbf16>, vector<2x32xf32> -> vector<2x32xf32>
    %70 = vector.broadcast %59 : vector<1x32xf32> to vector<2x32xf32>
    %71 = arith.addf %69, %70 : vector<2x32xf32>
    %72 = vector.extract_strided_slice %71 {offsets = [0, 0], sizes = [2, 4], strides = [1, 1]} : vector<2x32xf32> to vector<2x4xf32>
    %c0_41 = arith.constant 0 : index
    %c0_42 = arith.constant 0 : index
    %73 = vector.load %arg5[%c0_41, %c0_42] : memref<2x4xf32, #tpu.memory_space<vmem>>, vector<2x4xf32>
    tpu.vector_store %arg5[%c0_41, %c0_42], %72 {strides = array<i32>} : memref<2x4xf32, #tpu.memory_space<vmem>>, vector<2x4xf32>,
    return
  }
}

</mosaic_0001>

<bundles_post_ra>
// kernel: net_forward.1
= control target key start
LH: loop header
LB: loop body
LE: loop exit
PB: predicated region body
PF: predicated region fallthrough
CT: control target
= control target key end

     0   :  { %v970_v1 = vmov 0.0   ;;  %vm971_vm0 = vmmov 0   ;;  %vm47_vm1 = vcmask 130048   ;;  %s1157_s0 = inlined_call_operand.vmem [shape: bf16[16,16], index: 0, kind: input, shape index: {}]   ;;  %s1158_s1 = inlined_call_operand.vmem [shape: bf16[2,16], index: 1, kind: input, shape index: {}]   ;;  %s1159_s2 = inlined_call_operand.vmem [shape: bf16[16,32], index: 2, kind: input, shape index: {}]   ;;  %s1160_s3 = inlined_call_operand.vmem [shape: bf16[256,32], index: 3, kind: input, shape index: {}]   ;;  %s1161_s4 = inlined_call_operand.vmem [shape: f32[8,32], index: 4, kind: input, shape index: {}]   ;;  %s1162_s5 = inlined_call_operand.hbm [shape: f32[2,4], index: 5, kind: output, shape index: {}]  }
   0x1   :  { %v928_v0 = vld [vmem:[%s1159_s2] sm:$0xff]   ;;  %837 = vmatprep.subr.bf16.mxu0 %v970_v1  ;;  %843 = vmatprep.subr.bf16.mxu1 %v970_v1 }
   0x2   :  { %v1010_v2 = vld [vmem:[%s1157_s0] sm:$0xff]   ;;  %838 = vmatpush3.bf16.msra.mxu0 %v928_v0  ;;  %839 = vmatprep.mubr.msk.bf16.mxu0 %vm971_vm0, %v970_v1 }
   0x3   :  { %v930_v3 = vld [vmem:[%s1160_s3] sm:$0xff]   ;;  %847 = vmatprep.mubr.msk.bf16.mxu1 %vm971_vm0, %v970_v1  ;;  %851 = vmatprep.subr.bf16.mxu0 %v970_v1 }
   0x4   :  { %844 = vmatpush3.bf16.msra.mxu1 %v930_v3 }
   0x5   :  { %840 = vmatmul.mubr.msk.bf16.vlgmr.msra.gmra.mrb[0].mxu0 %vm47_vm1, %v1010_v2  ;;  %845 = vmatprep.subr.bf16.mxu1 %v970_v1 }
   0x6   :  { %855 = vmatprep.mubr.msk.bf16.mxu0 %vm971_vm0, %v970_v1 }
   0x7   :  { %10 = vsyncpa [#allocation3], 0  ;;  %v931_v4 = vld [vmem:[%s1160_s3 + $0x8] sm:$0xff]   ;;  %vm109_vm2 = vcmask 261120   ;;  %v932_v10 = vld [vmem:[%s1160_s3 + $0x10] sm:$0xff]   ;;  %s972_s17 = smov [#allocation2]  }
   0x8   :  { %846 = vmatpush3.bf16.msra.mxu1 %v931_v4  ;;  %852 = vmatpush3.bf16.msra.mxu0 %v932_v10  ;;  %v933_v11 = vld [vmem:[%s1160_s3 + $0x18] sm:$0xff]   ;;  %v770_v12 = vld [vmem:[%s1161_s4] ss:$0 sm:$0xff]  ;;  %v774_v23 = vld [vmem:[%s1161_s4 + $0x1] ss:$0 sm:$0xff]  ;;  %vm751_vm3 = vcmask 25600  }
   0x9   :  { %859 = vmatprep.subr.bf16.mxu1 %v970_v1  ;;  %853 = vmatprep.subr.bf16.mxu0 %v970_v1  ;;  %v934_v22 = vld [vmem:[%s1160_s3 + $0x20] sm:$0xff]   ;;  %v935_v33 = vld [vmem:[%s1160_s3 + $0x28] sm:$0xff]   ;;  %v936_v39 = vld [vmem:[%s1160_s3 + $0x30] sm:$0xff]  }
   0xa   :  { %v937_v40 = vld [vmem:[%s1160_s3 + $0x38] sm:$0xff]   ;;  %v779_v41 = vld [vmem:[%s1161_s4 + $0x2] ss:$0 sm:$0xff]  ;;  %v783_v52 = vld [vmem:[%s1161_s4 + $0x3] ss:$0 sm:$0xff] }
   0xb   :  { %v938_v51 = vld [vmem:[%s1160_s3 + $0x40] sm:$0xff]   ;;  %v939_v62 = vld [vmem:[%s1160_s3 + $0x48] sm:$0xff]  }
   0xc   :  { %854 = vmatpush3.bf16.msra.mxu0 %v933_v11 }
   0xd   :  { %865 = vmatprep.subr.bf16.mxu0 %v970_v1 }
  0xd8   :  { %v85_v5 = vpop.f32.mrb[0].mxu0 }
  0xd9   :  { %v841_v6 = vpop.f32.mrb[1].mxu0 }
  0xda   :  { %v88_v7 = vpop.f32.mrb[2].mxu0  ;;  %v941_v6 = vld [vmem:[%s1160_s3 + $0x58] sm:$0xff]  }
  0xdb   :  { %v92_v8 = vpack.c.bf16 %v88_v7, %v85_v5  ;;  %v842_v9 = vpop.f32.mrb[3].mxu0  ;;  %v788_v7 = vld [vmem:[%s1161_s4 + $0x4] ss:$0 sm:$0xff] }
  0xdd   :  { %848 = vmatmul.mubr.msk.bf16.vlgmr.msra.gmra.mrb[0].mxu1 %vm109_vm2, %v92_v8 }
  0xde   :  { %861 = vmatprep.mubr.msk.bf16.mxu1 %vm971_vm0, %v970_v1 }
 0x1b0   :  { %v147_v13 = vpop.f32.mrb[0].mxu1 }
 0x1b1   :  { %v148_v14 = vadd.f32 %v770_v12, %v147_v13  ;;  %v849_v15 = vpop.f32.mrb[1].mxu1 }
 0x1b2   :  { %v150_v16 = vpop.f32.mrb[2].mxu1 }
 0x1b3   :  { %v151_v17 = vadd.f32 %v770_v12, %v150_v16  ;;  %v850_v18 = vpop.f32.mrb[3].mxu1  ;;  %v154_v19 = vmax.f32 %v148_v14, 0.0 }
 0x1b4   :  { %v792_v18 = vld [vmem:[%s1161_s4 + $0x5] ss:$0 sm:$0xff] }
 0x1b5   :  { %v155_v20 = vmax.f32 %v151_v17, 0.0  ;;  %v942_v17 = vld [vmem:[%s1160_s3 + $0x60] sm:$0xff]  }
 0x1b7   :  { %v156_v21 = vpack.c.bf16 %v155_v20, %v154_v19 }
 0x1b9   :  { %856 = vmatmul.mubr.msk.bf16.vlgmr.msra.gmra.mrb[4].mxu0 %vm109_vm2, %v156_v21 }
 0x1ba   :  { %869 = vmatprep.mubr.msk.bf16.mxu0 %vm971_vm0, %v970_v1  ;;  %866 = vmatpush3.bf16.msra.mxu0 %v934_v22 }
 0x1bb   :  { %867 = vmatprep.subr.bf16.mxu0 %v970_v1 }
 0x1be   :  { %868 = vmatpush3.bf16.msra.mxu0 %v935_v33 }
 0x1bf   :  { %881 = vmatprep.subr.bf16.mxu0 %v970_v1 }
 0x28c   :  { %v210_v24 = vpop.f32.mrb[4].mxu0 }
 0x28d   :  { %v211_v25 = vadd.f32 %v774_v23, %v210_v24  ;;  %v857_v26 = vpop.f32.mrb[5].mxu0 }
 0x28e   :  { %v213_v27 = vpop.f32.mrb[6].mxu0 }
 0x28f   :  { %v214_v28 = vadd.f32 %v774_v23, %v213_v27  ;;  %v858_v29 = vpop.f32.mrb[7].mxu0  ;;  %v217_v30 = vmax.f32 %v211_v25, 0.0 }
 0x290   :  { %v943_v29 = vld [vmem:[%s1160_s3 + $0x68] sm:$0xff]  }
 0x291   :  { %v218_v31 = vmax.f32 %v214_v28, 0.0  ;;  %v586_v28 = vld [vmem:[%s1158_s1] sm:$0x1] }
 0x293   :  { %v219_v32 = vpack.c.bf16 %v218_v31, %v217_v30 }
 0x295   :  { %860 = vmatpush3.bf16.msra.mxu1 %v219_v32 }
 0x296   :  { %873 = vmatprep.subr.bf16.mxu1 %v970_v1 }
 0x298   :  { %862 = vmatmul.mubr.msk.bf16.vlgmr.msra.gmra.mrb[4].mxu1 %vm47_vm1, %v1010_v2 }
 0x299   :  { %877 = vmatprep.mubr.msk.bf16.mxu1 %vm971_vm0, %v970_v1  ;;  %874 = vmatpush3.bf16.msra.mxu1 %v936_v39 }
 0x29a   :  { %875 = vmatprep.subr.bf16.mxu1 %v970_v1 }
 0x29d   :  { %876 = vmatpush3.bf16.msra.mxu1 %v937_v40 }
 0x29e   :  { %887 = vmatprep.subr.bf16.mxu1 %v970_v1 }
 0x36b   :  { %v264_v34 = vpop.f32.mrb[4].mxu1 }
 0x36c   :  { %v863_v35 = vpop.f32.mrb[5].mxu1 }
 0x36d   :  { %v267_v36 = vpop.f32.mrb[6].mxu1  ;;  %v944_v35 = vld [vmem:[%s1160_s3 + $0x70] sm:$0xff]  }
 0x36e   :  { %v271_v37 = vpack.c.bf16 %v267_v36, %v264_v34  ;;  %v864_v38 = vpop.f32.mrb[7].mxu1  ;;  %v945_v36 = vld [vmem:[%s1160_s3 + $0x78] sm:$0xff]  }
 0x370   :  { %870 = vmatmul.mubr.msk.bf16.vlgmr.msra.gmra.mrb[8].mxu0 %vm109_vm2, %v271_v37  ;;  %v797_v37 = vld [vmem:[%s1161_s4 + $0x6] ss:$0 sm:$0xff] }
 0x371   :  { %883 = vmatprep.mubr.msk.bf16.mxu0 %vm971_vm0, %v970_v1 }
 0x443   :  { %v325_v42 = vpop.f32.mrb[8].mxu0 }
 0x444   :  { %v326_v43 = vadd.f32 %v779_v41, %v325_v42  ;;  %v871_v44 = vpop.f32.mrb[9].mxu0 }
 0x445   :  { %v328_v45 = vpop.f32.mrb[10].mxu0 }
 0x446   :  { %v329_v46 = vadd.f32 %v779_v41, %v328_v45  ;;  %v872_v47 = vpop.f32.mrb[11].mxu0  ;;  %v332_v48 = vmax.f32 %v326_v43, 0.0 }
 0x448   :  { %v333_v49 = vmax.f32 %v329_v46, 0.0 }
 0x44a   :  { %v334_v50 = vpack.c.bf16 %v333_v49, %v332_v48 }
 0x44c   :  { %878 = vmatmul.mubr.msk.bf16.vlgmr.msra.gmra.mrb[8].mxu1 %vm109_vm2, %v334_v50 }
 0x44d   :  { %891 = vmatprep.mubr.msk.bf16.mxu1 %vm971_vm0, %v970_v1  ;;  %888 = vmatpush3.bf16.msra.mxu1 %v938_v51 }
 0x44e   :  { %889 = vmatprep.subr.bf16.mxu1 %v970_v1 }
 0x451   :  { %890 = vmatpush3.bf16.msra.mxu1 %v939_v62 }
 0x452   :  { %903 = vmatprep.subr.bf16.mxu1 %v970_v1 }
 0x51f   :  { %v388_v53 = vpop.f32.mrb[8].mxu1 }
 0x520   :  { %v389_v54 = vadd.f32 %v783_v52, %v388_v53  ;;  %v879_v55 = vpop.f32.mrb[9].mxu1 }
 0x521   :  { %v391_v56 = vpop.f32.mrb[10].mxu1 }
 0x522   :  { %v392_v57 = vadd.f32 %v783_v52, %v391_v56  ;;  %v880_v58 = vpop.f32.mrb[11].mxu1  ;;  %v395_v59 = vmax.f32 %v389_v54, 0.0 }
 0x524   :  { %v396_v60 = vmax.f32 %v392_v57, 0.0 }
 0x526   :  { %v397_v61 = vpack.c.bf16 %v396_v60, %v395_v59 }
 0x528   :  { %882 = vmatpush3.bf16.msra.mxu0 %v397_v61 }
 0x529   :  { %895 = vmatprep.subr.bf16.mxu0 %v970_v1 }
 0x52b   :  { %884 = vmatmul.mubr.msk.bf16.vlgmr.msra.gmra.mrb[12].mxu0 %vm47_vm1, %v1010_v2  ;;  %v940_v2 = vld [vmem:[%s1160_s3 + $0x50] sm:$0xff]   ;;  %s759_s3 = sshll.u32 %s972_s17, 4  ;;  %s760_s3 = int_to_ptr.vmem [resolvable:$true] %s759_s3 }
 0x52c   :  { %899 = vmatprep.mubr.msk.bf16.mxu0 %vm971_vm0, %v970_v1  ;;  %896 = vmatpush3.bf16.msra.mxu0 %v940_v2  ;;  %s946_s18 = scalar_lea.vmem %s760_s3, 32  ;;  %p951_p1 = scmp.lt.s32.totalorder %s760_s3, %s760_s3 }
 0x52d   :  { %897 = vmatprep.subr.bf16.mxu0 %v970_v1  ;;  %p947_p0 = scmp.ne.s32.totalorder %s760_s3, %s946_s18  ;;  %p952_p2 = scmp.lt.s32.totalorder %s946_s18, %s946_s18 }
 0x52f   :  { %p953_p3 = por %p952_p2, %p951_p1 }
 0x530   :  { %898 = vmatpush3.bf16.msra.mxu0 %v941_v6 }
 0x531   :  { %909 = vmatprep.subr.bf16.mxu0 %v970_v1  ;;  %p954_p4 = pnand %p953_p3, %p947_p0 }
 0x5fe   :  { %v442_v63 = vpop.f32.mrb[12].mxu0 }
 0x5ff   :  { %v885_v0 = vpop.f32.mrb[13].mxu0 }
 0x600   :  { %v445_v3 = vpop.f32.mrb[14].mxu0 }
 0x601   :  { %v449_v4 = vpack.c.bf16 %v445_v3, %v442_v63  ;;  %v886_v5 = vpop.f32.mrb[15].mxu0 }
 0x603   :  { %892 = vmatmul.mubr.msk.bf16.vlgmr.msra.gmra.mrb[12].mxu1 %vm109_vm2, %v449_v4 }
 0x604   :  { %905 = vmatprep.mubr.msk.bf16.mxu1 %vm971_vm0, %v970_v1 }
 0x6d6   :  { %v503_v8 = vpop.f32.mrb[12].mxu1 }
 0x6d7   :  { %v504_v9 = vadd.f32 %v788_v7, %v503_v8  ;;  %v893_v10 = vpop.f32.mrb[13].mxu1 }
 0x6d8   :  { %v506_v11 = vpop.f32.mrb[14].mxu1 }
 0x6d9   :  { %v507_v12 = vadd.f32 %v788_v7, %v506_v11  ;;  %v894_v13 = vpop.f32.mrb[15].mxu1  ;;  %v510_v14 = vmax.f32 %v504_v9, 0.0 }
 0x6db   :  { %v511_v15 = vmax.f32 %v507_v12, 0.0 }
 0x6dd   :  { %v512_v16 = vpack.c.bf16 %v511_v15, %v510_v14 }
 0x6df   :  { %900 = vmatmul.mubr.msk.bf16.vlgmr.msra.gmra.mrb[16].mxu0 %vm109_vm2, %v512_v16 }
 0x6e0   :  { %913 = vmatprep.mubr.msk.bf16.mxu0 %vm971_vm0, %v970_v1  ;;  %910 = vmatpush3.bf16.msra.mxu0 %v942_v17 }
 0x6e1   :  { %911 = vmatprep.subr.bf16.mxu0 %v970_v1 }
 0x6e4   :  { %912 = vmatpush3.bf16.msra.mxu0 %v943_v29 }
 0x7b2   :  { %v566_v19 = vpop.f32.mrb[16].mxu0 }
 0x7b3   :  { %v567_v20 = vadd.f32 %v792_v18, %v566_v19  ;;  %v901_v21 = vpop.f32.mrb[17].mxu0 }
 0x7b4   :  { %v569_v22 = vpop.f32.mrb[18].mxu0 }
 0x7b5   :  { %v570_v23 = vadd.f32 %v792_v18, %v569_v22  ;;  %v902_v24 = vpop.f32.mrb[19].mxu0  ;;  %v573_v25 = vmax.f32 %v567_v20, 0.0 }
 0x7b7   :  { %v574_v26 = vmax.f32 %v570_v23, 0.0 }
 0x7b9   :  { %v575_v27 = vpack.c.bf16 %v574_v26, %v573_v25 }
 0x7bb   :  { %904 = vmatpush3.bf16.msra.mxu1 %v575_v27 }
 0x7bc   :  { %917 = vmatprep.subr.bf16.mxu1 %v970_v1 }
 0x7be   :  { %906 = vmatmul.mubr.msk.bf16.vlgmr.msra.gmra.mrb[16].mxu1 %vm47_vm1, %v586_v28 }
 0x7bf   :  { %921 = vmatprep.mubr.msk.bf16.mxu1 %vm971_vm0, %v970_v1  ;;  %918 = vmatpush3.bf16.msra.mxu1 %v944_v35 }
 0x7c0   :  { %919 = vmatprep.subr.bf16.mxu1 %v970_v1  ;;  %v801_v1 = vld [vmem:[%s1161_s4 + $0x7] ss:$0 sm:$0xff] }
 0x7c3   :  { %920 = vmatpush3.bf16.msra.mxu1 %v945_v36 }
 0x891   :  { %v624_v30 = vpop.f32.mrb[16].mxu1 }
 0x892   :  { %v630_v31 = vpack.c.bf16 %v624_v30, %v624_v30  ;;  %v907_v32 = vpop.f32.mrb[17].mxu1 }
 0x893   :  { %v627_v33 = vpop.f32.mrb[18].mxu1 }
 0x894   :  { %v908_v34 = vpop.f32.mrb[19].mxu1  ;;  %914 = vmatmul.mubr.msk.bf16.vlgmr.msra.gmra.mrb[20].mxu0 %vm109_vm2, %v630_v31 }
 0x967   :  { %v684_v38 = vpop.f32.mrb[20].mxu0 }
 0x968   :  { %v685_v39 = vadd.f32 %v797_v37, %v684_v38  ;;  %v915_v40 = vpop.f32.mrb[21].mxu0 }
 0x969   :  { %v687_v41 = vpop.f32.mrb[22].mxu0 }
 0x96a   :  { %v690_v42 = vmax.f32 %v685_v39, 0.0  ;;  %v916_v43 = vpop.f32.mrb[23].mxu0 }
 0x96c   :  { %v691_v44 = vpack.c.bf16 %v690_v42, %v690_v42 }
 0x96e   :  { %922 = vmatmul.mubr.msk.bf16.vlgmr.msra.gmra.mrb[20].mxu1 %vm109_vm2, %v691_v44 }
 0xa41   :  { %v745_v45 = vpop.f32.mrb[20].mxu1 }
 0xa42   :  { %v746_v46 = vadd.f32 %v801_v1, %v745_v45  ;;  %v923_v47 = vpop.f32.mrb[21].mxu1 }
 0xa43   :  { %v748_v48 = vpop.f32.mrb[22].mxu1 }
 0xa44   :  { %v924_v49 = vpop.f32.mrb[23].mxu1  ;;  %752 = vst.msk [vmem:[#allocation2] sm:$0x3] %vm751_vm3, %v746_v46 }
 0xa45   :  { %957 = shalt.err (!%p954_p4)
}
 0xa46   :  { %s958_s4 = scalar_lea.hbm %s1162_s5, 32 }
 0xa47   :  { %p959_p5 = scmp.ne.s32.totalorder %s1162_s5, %s958_s4  ;;  %p962_p6 = scmp.lt.u32.totalorder %s958_s4, %s1162_s5 }
 0xa49   :  { %p964_p7 = pnand %p962_p6, %p959_p5 }
 0xa4b   :  { %967 = shalt.err (!%p964_p7)
}
 0xa4c   :  { %762 = dma.vmem_to_hbm [thread:$0]  %s760_s3, 32, %s1162_s5, [#allocation3]  }
 0xa4d   :  { %968 = dma.done.wait [#allocation3], 32  }
 0xa4e   :  { %969 = vsyncadd [#allocation3], 4294967264 }
 0xa4f   :  { %766 = vsyncpa [#allocation3], 1 }

</bundles_post_ra>
